<compile_context>
chip_gen: v5e
topology: v5e:2x2
jax: 0.10.0
libtpu: 0.0.40
codegen_flags: <defaults>
</compile_context>

<pallas_src>
import jax
import jax.numpy as jnp
from jax.experimental import pallas as pl
from jax.experimental.pallas import tpu as pltpu


K_ALIGN = 256            # K tile granularity (lane/sublane friendly for bf16)
_PALLAS_MIN_WORK = 1 << 22  # N*K*D below this -> plain XLA dot is faster


def _round_up(x: int, m: int) -> int:
    return ((x + m - 1) // m) * m


def _vmem_budget_bytes() -> int:
    """~75% of physical VMEM: 96 MiB on v5e/v6e (128 MiB), 48 MiB on v7x (64 MiB)."""
    cap = 64 * 1024 * 1024
    try:
        info = pltpu.get_tpu_info()
        cap = int(getattr(info, "vmem_capacity_bytes", cap))
    except Exception:
        pass
    return (cap * 3) // 4


def _embed_kernel(x_ref, w_ref, o_ref):
    # Grid = (N tiles, K tiles); K (reduction) is the innermost axis, so the
    # output block is resident in VMEM across k.  x arrives f32 and is cast to
    # bf16 here (VPU cast hides under the MXU); weight is already bf16.
    part = jnp.dot(
        x_ref[...].astype(jnp.bfloat16),
        w_ref[...],
        preferred_element_type=jnp.float32,
    )

    @pl.when(pl.program_id(1) == 0)
    def _():
        o_ref[...] = part            # first K step: plain store (no zero-fill / RMW)

    @pl.when(pl.program_id(1) > 0)
    def _():
        o_ref[...] += part           # subsequent K steps: accumulate in f32


def embed_matmul(x2d: jax.Array, w: jax.Array, *, block_n_max: int = 256) -> jax.Array:
    """Pallas tiled matmul: (N, K) @ (Kw, D) -> (N, D), f32 output.

    `w` is expected in kernel layout (bf16, Kw >= K with zero rows beyond K,
    ideally Kw a multiple of K_ALIGN, as stored by LinearBackbone.__init__).
    x stays f32; padding of N/K with zeros is mathematically inert.
    """
    N, K = x2d.shape
    Kw, D = w.shape
    assert Kw >= K, (Kw, K)

    # Weight K padding is normally done once at init; this is a no-op then.
    k_pad = _round_up(Kw, K_ALIGN)
    w = w.astype(jnp.bfloat16)
    if k_pad != Kw:
        w = jnp.pad(w, ((0, k_pad - Kw), (0, 0)))

    # N tile: 16-aligned (bf16 sublane packing); >=2 tiles when possible so the
    # second TensorCore on v7x gets work on the "parallel" axis.
    block_n = min(block_n_max, _round_up(N, 16))
    if N > 16 and _round_up(N, block_n) // block_n < 2:
        block_n = _round_up((N + 1) // 2, 16)
    n_pad = _round_up(N, block_n)

    # K tile from the per-generation VMEM budget. d_vmem models the lane-padded
    # VMEM footprint of the (un-padded-in-HBM) last dim.
    budget = _vmem_budget_bytes()
    d_vmem = _round_up(D, 128)
    resident = 2 * block_n * d_vmem * 4                 # resident f32 output block
    per_k = 2 * (block_n * 4 + d_vmem * 2)              # dbl-buffered x(f32) + w(bf16) per K row
    avail = max(budget - resident, per_k * K_ALIGN)
    tk_cap = max(K_ALIGN, min((avail // per_k) // K_ALIGN * K_ALIGN, k_pad))
    # Largest K_ALIGN-multiple <= tk_cap that divides k_pad (keeps weight un-re-padded).
    tk = K_ALIGN
    t = tk_cap
    while t >= K_ALIGN:
        if k_pad % t == 0:
            tk = t
            break
        t -= K_ALIGN

    # Pad x (f32, zeros) to the tiled shape; no bf16 copy is materialized.
    if (n_pad, k_pad) != (N, K):
        x2d = jnp.pad(x2d, ((0, n_pad - N), (0, k_pad - K)))

    n_tiles = n_pad // block_n
    grid = (n_tiles, k_pad // tk)

    out = pl.pallas_call(
        _embed_kernel,
        out_shape=jax.ShapeDtypeStruct((n_pad, D), jnp.float32),
        grid_spec=pltpu.PrefetchScalarGridSpec(
            num_scalar_prefetch=0,
            grid=grid,
            in_specs=[
                pl.BlockSpec((block_n, tk), lambda i, k: (i, k)),
                pl.BlockSpec((tk, D), lambda i, k: (k, 0)),   # full-D last axis (no HBM pad)
            ],
            out_specs=pl.BlockSpec((block_n, D), lambda i, k: (i, 0)),
        ),
        compiler_params=pltpu.CompilerParams(
            # N axis parallel (megacore on v7x); K is the reduction -> arbitrary.
            dimension_semantics=("parallel", "arbitrary"),
            vmem_limit_bytes=max(32 * 1024 * 1024, budget),
        ),
        cost_estimate=pl.CostEstimate(
            flops=2 * n_pad * k_pad * D,
            transcendentals=0,
            bytes_accessed=(
                n_pad * k_pad * 4              # x (f32), read once
                + k_pad * D * 2 * n_tiles      # w (bf16), re-streamed per N tile
                + n_pad * D * 4                # out (f32)
            ),
        ),
    )(x2d, w)
    return out[:N, :D]


class Backbone:
    """JAX/Pallas port of the abstract PyTorch `Backbone` interface."""

    def __init__(self, input_size):
        self.input_size = input_size
        self.embedding_dim_size = None

    def embedding_size(self) -> int:
        """Returns embedding size, probing forward on (1, *input_size) if needed."""
        if self.embedding_dim_size is None:
            sample = jax.random.uniform(
                jax.random.PRNGKey(0), (1, *self.input_size), jnp.float32
            )
            self.embedding_dim_size = int(self.forward(sample).shape[1])
        return self.embedding_dim_size

    def forward(self, x):
        # TODO(synk): forward is abstract in the reference module (raises NotImplementedError).
        raise NotImplementedError


class LinearBackbone(Backbone):
    """Minimal concrete backbone: flatten NCHW and project to `embedding_dim`."""

    def __init__(self, input_size, embedding_dim: int = 32, force_pallas: bool = False):
        super().__init__(input_size)
        C, H, W = input_size
        K = C * H * W
        self._k_real = K
        self._force_pallas = force_pallas
        # Deterministic synthetic parameters (no checkpoint loading), stored
        # ONCE in kernel layout: bf16, K zero-padded to a K_ALIGN multiple.
        key = jax.random.PRNGKey(42)
        w_f32 = jax.random.normal(key, (K, embedding_dim), jnp.float32) / jnp.sqrt(
            jnp.float32(K)
        )
        wb = w_f32.astype(jnp.bfloat16)
        k_pad = _round_up(K, K_ALIGN)
        if k_pad != K:
            wb = jnp.pad(wb, ((0, k_pad - K), (0, 0)))
        self.weight = wb  # (k_pad, embedding_dim), bf16

    def forward(self, x: jax.Array) -> jax.Array:
        N = x.shape[0]
        x2d = x.reshape(N, -1).astype(jnp.float32)  # glue: NCHW -> (N, C*H*W), f32
        K = x2d.shape[1]
        D = self.weight.shape[1]
        # Tiny problems: pallas_call fixed overhead dominates -> plain XLA dot.
        if not self._force_pallas and N * K * D < _PALLAS_MIN_WORK:
            return jnp.dot(
                x2d.astype(jnp.bfloat16),
                self.weight[:K],
                preferred_element_type=jnp.float32,
            )
        return embed_matmul(x2d, self.weight)


if __name__ == "__main__":
    # Small shapes consistent with a spectrogram backbone: (C, H, W) = (4, 16, 16)
    input_size = (4, 16, 16)
    # force_pallas=True so the self-test exercises the Pallas kernel even at the
    # tiny shipped shape (the default heuristic would use the jnp.dot fallback).
    backbone = LinearBackbone(input_size, embedding_dim=32, force_pallas=True)

    key = jax.random.PRNGKey(0)
    x = jax.random.normal(key, (2, *input_size), jnp.float32)  # NCHW

    out = backbone.forward(x)
    out = jax.block_until_ready(out)

    # Pure-JAX reference: same bf16 operands, f32 accumulation.
    x2d = x.reshape(2, -1)
    ref = jnp.dot(
        x2d.astype(jnp.bfloat16),
        backbone.weight[: x2d.shape[1]],
        preferred_element_type=jnp.float32,
    )
    assert out.shape == (2, 32), out.shape
    assert out.dtype == jnp.float32, out.dtype
    assert jnp.allclose(out, ref, atol=2e-2, rtol=2e-2)

    # The default (non-forced) path uses the jnp.dot fallback at tiny sizes and
    # must agree with the kernel path.
    backbone_auto = LinearBackbone(input_size, embedding_dim=32)
    out_auto = jax.block_until_ready(backbone_auto.forward(x))
    assert jnp.allclose(out_auto, ref, atol=2e-2, rtol=2e-2)

    # Interface semantics: embedding_size() probes forward on (1, *input_size).
    assert backbone.embedding_size() == 32

    print("KERNEL_OK")
</pallas_src>

<mosaic_0001>
module attributes {stable_mosaic.version = 11 : i64} {
  func.func @_embed_kernel(%arg0: i32, %arg1: i32, %arg2: memref<16x1024xf32, #tpu.memory_space<vmem>>, %arg3: memref<1024x32xbf16, #tpu.memory_space<vmem>>, %arg4: memref<16x32xf32, #tpu.memory_space<vmem>>) attributes {dimension_semantics = [#tpu.dimension_semantics<parallel>, #tpu.dimension_semantics<arbitrary>], iteration_bounds = array<i64: 1, 1>, scalar_prefetch = 0 : i64, scratch_operands = 0 : i64, tpu.core_type = #tpu.core_type<tc>, window_params = [{transform_indices = @transform_0, window_bounds = array<i64: 16, 1024>}, {transform_indices = @transform_1, window_bounds = array<i64: 1024, 32>}, {transform_indices = @transform_2, window_bounds = array<i64: 16, 32>}]} {
    %c0 = arith.constant 0 : index
    %c0_0 = arith.constant 0 : index
    %0 = vector.load %arg2[%c0, %c0_0] : memref<16x1024xf32, #tpu.memory_space<vmem>>, vector<16x1024xf32>
    %1 = arith.truncf %0 : vector<16x1024xf32> to vector<16x1024xbf16>
    %c0_1 = arith.constant 0 : index
    %c0_2 = arith.constant 0 : index
    %2 = vector.load %arg3[%c0_1, %c0_2] : memref<1024x32xbf16, #tpu.memory_space<vmem>>, vector<1024x32xbf16>
    %cst = arith.constant dense<0.000000e+00> : vector<16x32xf32>
    %3 = tpu.matmul %1, %2, %cst {dimension_numbers = #tpu.dot_dimension_numbers<[1], [0], [0], [1], [0, 0, 1, 1], [], []>} : vector<16x1024xbf16>, vector<1024x32xbf16>, vector<16x32xf32> -> vector<16x32xf32>
    %c0_i32 = arith.constant 0 : i32
    %4 = arith.cmpi eq, %arg1, %c0_i32 : i32
    %5 = arith.extui %4 : i1 to i32
    %c0_i32_3 = arith.constant 0 : i32
    %6 = arith.cmpi ne, %5, %c0_i32_3 : i32
    scf.if %6 {
      %c0_6 = arith.constant 0 : index
      %c0_7 = arith.constant 0 : index
      %10 = vector.load %arg4[%c0_6, %c0_7] : memref<16x32xf32, #tpu.memory_space<vmem>>, vector<16x32xf32>
      tpu.vector_store %arg4[%c0_6, %c0_7], %3 {strides = array<i32>} : memref<16x32xf32, #tpu.memory_space<vmem>>, vector<16x32xf32>,
    } else {
    }
    %c0_i32_4 = arith.constant 0 : i32
    %7 = arith.cmpi sgt, %arg1, %c0_i32_4 : i32
    %8 = arith.extui %7 : i1 to i32
    %c0_i32_5 = arith.constant 0 : i32
    %9 = arith.cmpi ne, %8, %c0_i32_5 : i32
    scf.if %9 {
      %c0_6 = arith.constant 0 : index
      %c0_7 = arith.constant 0 : index
      %10 = vector.load %arg4[%c0_6, %c0_7] : memref<16x32xf32, #tpu.memory_space<vmem>>, vector<16x32xf32>
      %11 = arith.addf %10, %3 : vector<16x32xf32>
      %c0_8 = arith.constant 0 : index
      %c0_9 = arith.constant 0 : index
      %12 = vector.load %arg4[%c0_8, %c0_9] : memref<16x32xf32, #tpu.memory_space<vmem>>, vector<16x32xf32>
      tpu.vector_store %arg4[%c0_8, %c0_9], %11 {strides = array<i32>} : memref<16x32xf32, #tpu.memory_space<vmem>>, vector<16x32xf32>,
    } else {
    }
    return
  }
  func.func @transform_0(%arg0: i32, %arg1: i32) -> (i32, i32) {
    %c0_i32 = arith.constant 0 : i32
    return %arg0, %arg1 : i32, i32
  }
  func.func @transform_1(%arg0: i32, %arg1: i32) -> (i32, i32) {
    %c0_i32 = arith.constant 0 : i32
    %c0_i32_0 = arith.constant 0 : i32
    return %arg1, %c0_i32 : i32, i32
  }
  func.func @transform_2(%arg0: i32, %arg1: i32) -> (i32, i32) {
    %c0_i32 = arith.constant 0 : i32
    %c0_i32_0 = arith.constant 0 : i32
    return %arg0, %c0_i32 : i32, i32
  }
}

</mosaic_0001>

<bundles_post_ra>
// kernel: tpu_custom_call.1
= control target key start
LH: loop header
LB: loop body
LE: loop exit
PB: predicated region body
PF: predicated region fallthrough
CT: control target
= control target key end

     0   :  { %s1306_s0 = inlined_call_operand.vmem [shape: f32[16,1024], index: 0, kind: input, shape index: {}]   ;;  %s1307_s1 = inlined_call_operand.vmem [shape: bf16[1024,32], index: 1, kind: input, shape index: {}]   ;;  %s1308_s2 = inlined_call_operand.hbm [shape: f32[16,32], index: 2, kind: output, shape index: {}]  }
   0x1   :  { %v959_v0 = vld [vmem:[%s1307_s1 + $0x38] sm:$0xff]  ;;  %v958_v4 = vld [vmem:[%s1307_s1 + $0x30] sm:$0xff]  ;;  %v957_v8 = vld [vmem:[%s1307_s1 + $0x28] sm:$0xff] }
   0x2   :  { %v967_v1 = vld [vmem:[%s1307_s1 + $0x78] sm:$0xff]  ;;  %548 = vmatpush.bf16.msra.mxu0 %v959_v0  ;;  %v966_v5 = vld [vmem:[%s1307_s1 + $0x70] sm:$0xff]  ;;  %v965_v9 = vld [vmem:[%s1307_s1 + $0x68] sm:$0xff] }
   0x3   :  { %v975_v2 = vld [vmem:[%s1307_s1 + $0xb8] sm:$0xff]  ;;  %562 = vmatpush.bf16.msra.mxu1 %v967_v1  ;;  %v974_v6 = vld [vmem:[%s1307_s1 + $0xb0] sm:$0xff]  ;;  %v973_v10 = vld [vmem:[%s1307_s1 + $0xa8] sm:$0xff] }
   0x4   :  { %v983_v3 = vld [vmem:[%s1307_s1 + $0xf8] sm:$0xff]  ;;  %576 = vmatpush.bf16.msra.mxu2 %v975_v2  ;;  %v982_v7 = vld [vmem:[%s1307_s1 + $0xf0] sm:$0xff]  ;;  %v981_v11 = vld [vmem:[%s1307_s1 + $0xe8] sm:$0xff] }
   0x5   :  { %590 = vmatpush.bf16.msra.mxu3 %v983_v3  ;;  %v956_v12 = vld [vmem:[%s1307_s1 + $0x20] sm:$0xff]  ;;  %v955_v16 = vld [vmem:[%s1307_s1 + $0x18] sm:$0xff]  ;;  %v954_v20 = vld [vmem:[%s1307_s1 + $0x10] sm:$0xff] }
   0x6   :  { %549 = vmatpush.bf16.msra.mxu0 %v958_v4  ;;  %v964_v13 = vld [vmem:[%s1307_s1 + $0x60] sm:$0xff]  ;;  %v963_v17 = vld [vmem:[%s1307_s1 + $0x58] sm:$0xff]  ;;  %v962_v21 = vld [vmem:[%s1307_s1 + $0x50] sm:$0xff] }
   0x7   :  { %563 = vmatpush.bf16.msra.mxu1 %v966_v5  ;;  %v972_v14 = vld [vmem:[%s1307_s1 + $0xa0] sm:$0xff]  ;;  %v971_v18 = vld [vmem:[%s1307_s1 + $0x98] sm:$0xff]  ;;  %v970_v22 = vld [vmem:[%s1307_s1 + $0x90] sm:$0xff] }
   0x8   :  { %577 = vmatpush.bf16.msra.mxu2 %v974_v6  ;;  %v980_v15 = vld [vmem:[%s1307_s1 + $0xe0] sm:$0xff]  ;;  %v979_v19 = vld [vmem:[%s1307_s1 + $0xd8] sm:$0xff]  ;;  %v978_v23 = vld [vmem:[%s1307_s1 + $0xd0] sm:$0xff] }
   0x9   :  { %591 = vmatpush.bf16.msra.mxu3 %v982_v7 }
   0xa   :  { %550 = vmatpush.bf16.msra.mxu0 %v957_v8 }
   0xb   :  { %564 = vmatpush.bf16.msra.mxu1 %v965_v9 }
   0xc   :  { %578 = vmatpush.bf16.msra.mxu2 %v973_v10 }
   0xd   :  { %592 = vmatpush.bf16.msra.mxu3 %v981_v11 }
   0xe   :  { %551 = vmatpush.bf16.msra.mxu0 %v956_v12 }
   0xf   :  { %565 = vmatpush.bf16.msra.mxu1 %v964_v13 }
  0x10   :  { %579 = vmatpush.bf16.msra.mxu2 %v972_v14 }
  0x11   :  { %593 = vmatpush.bf16.msra.mxu3 %v980_v15 }
  0x12   :  { %552 = vmatpush.bf16.msra.mxu0 %v955_v16 }
  0x13   :  { %566 = vmatpush.bf16.msra.mxu1 %v963_v17 }
  0x14   :  { %580 = vmatpush.bf16.msra.mxu2 %v971_v18 }
  0x15   :  { %594 = vmatpush.bf16.msra.mxu3 %v979_v19 }
  0x16   :  { %7 = vsyncpa [#allocation3], 0  ;;  %553 = vmatpush.bf16.msra.mxu0 %v954_v20  ;;  %v953_v24 = vld [vmem:[%s1307_s1 + $0x8] sm:$0xff]  ;;  %v952_v28 = vld [vmem:[%s1307_s1] sm:$0xff]  ;;  %vm664_vm0 = vcmask 261120   ;;  %s684_s3 = sshll.u32 %s1308_s2, 4  ;;  %s685_s3 = int_to_ptr.hbm [resolvable:$true] %s684_s3 }
  0x17   :  { %567 = vmatpush.bf16.msra.mxu1 %v962_v21  ;;  %v961_v25 = vld [vmem:[%s1307_s1 + $0x48] sm:$0xff]  ;;  %v960_v29 = vld [vmem:[%s1307_s1 + $0x40] sm:$0xff]  ;;  %v991_v32 = vld [vmem:[%s1307_s1 + $0x138] sm:$0xff]  ;;  %s1046_s4 = smov 128   ;;  %s1047_s5 = smov 8  }
  0x18   :  { %581 = vmatpush.bf16.msra.mxu2 %v970_v22  ;;  %v969_v26 = vld [vmem:[%s1307_s1 + $0x88] sm:$0xff]  ;;  %v968_v30 = vld [vmem:[%s1307_s1 + $0x80] sm:$0xff]  ;;  %v999_v33 = vld [vmem:[%s1307_s1 + $0x178] sm:$0xff] }
  0x19   :  { %595 = vmatpush.bf16.msra.mxu3 %v978_v23  ;;  %v977_v27 = vld [vmem:[%s1307_s1 + $0xc8] sm:$0xff]  ;;  %v976_v31 = vld [vmem:[%s1307_s1 + $0xc0] sm:$0xff]  ;;  %v14_v34 = vld [vmem:[%s1306_s0 + $0x10] sm:$0xff] }
  0x1a   :  { %554 = vmatpush.bf16.msra.mxu0 %v953_v24  ;;  %v22_v35 = vld [vmem:[%s1306_s0 + $0x50] sm:$0xff]  ;;  %v15_v36 = vld [vmem:[%s1306_s0 + $0x18] sm:$0xff]  ;;  %v12_v38 = vld [vmem:[%s1306_s0] sm:$0xff] }
  0x1b   :  { %568 = vmatpush.bf16.msra.mxu1 %v961_v25  ;;  %v23_v37 = vld [vmem:[%s1306_s0 + $0x58] sm:$0xff]  ;;  %v20_v39 = vld [vmem:[%s1306_s0 + $0x40] sm:$0xff]  ;;  %v13_v40 = vld [vmem:[%s1306_s0 + $0x8] sm:$0xff]  ;;  %v30_v44 = vpack.c.bf16 %v22_v35, %v14_v34 }
  0x1c   :  { %582 = vmatpush.bf16.msra.mxu2 %v969_v26  ;;  %v21_v41 = vld [vmem:[%s1306_s0 + $0x48] sm:$0xff]  ;;  %v1007_v42 = vld [vmem:[%s1307_s1 + $0x1b8] sm:$0xff]  ;;  %v31_v45 = vpack.c.bf16 %v23_v37, %v15_v36  ;;  %v28_v46 = vpack.c.bf16 %v20_v39, %v12_v38  ;;  %v990_v48 = vld [vmem:[%s1307_s1 + $0x130] sm:$0xff] }
  0x1d   :  { %596 = vmatpush.bf16.msra.mxu3 %v977_v27  ;;  %v1015_v43 = vld [vmem:[%s1307_s1 + $0x1f8] sm:$0xff]  ;;  %v29_v47 = vpack.c.bf16 %v21_v41, %v13_v40  ;;  %v998_v49 = vld [vmem:[%s1307_s1 + $0x170] sm:$0xff]  ;;  %v989_v52 = vld [vmem:[%s1307_s1 + $0x128] sm:$0xff] }
  0x1e   :  { %555 = vmatpush.bf16.msra.mxu0 %v952_v28  ;;  %v1006_v50 = vld [vmem:[%s1307_s1 + $0x1b0] sm:$0xff]  ;;  %v997_v53 = vld [vmem:[%s1307_s1 + $0x168] sm:$0xff]  ;;  %v988_v56 = vld [vmem:[%s1307_s1 + $0x120] sm:$0xff] }
  0x1f   :  { %569 = vmatpush.bf16.msra.mxu1 %v960_v29  ;;  %v1014_v51 = vld [vmem:[%s1307_s1 + $0x1f0] sm:$0xff]  ;;  %v1005_v54 = vld [vmem:[%s1307_s1 + $0x1a8] sm:$0xff]  ;;  %v996_v57 = vld [vmem:[%s1307_s1 + $0x160] sm:$0xff] }
  0x20   :  { %583 = vmatpush.bf16.msra.mxu2 %v968_v30  ;;  %v1013_v55 = vld [vmem:[%s1307_s1 + $0x1e8] sm:$0xff]  ;;  %v1004_v58 = vld [vmem:[%s1307_s1 + $0x1a0] sm:$0xff]  ;;  %v987_v60 = vld [vmem:[%s1307_s1 + $0x118] sm:$0xff] }
  0x21   :  { %597 = vmatpush.bf16.msra.mxu3 %v976_v31  ;;  %556 = vmatmul.bf16.vlgmr.msra.gmra.mxu0 %v28_v46  ;;  %v1012_v59 = vld [vmem:[%s1307_s1 + $0x1e0] sm:$0xff]  ;;  %v995_v61 = vld [vmem:[%s1307_s1 + $0x158] sm:$0xff]  ;;  %v986_v0 = vld [vmem:[%s1307_s1 + $0x110] sm:$0xff] }
  0x22   :  { %604 = vmatpush.bf16.msrb.mxu0 %v991_v32  ;;  %570 = vmatmul.bf16.vlgmr.msra.gmra.mxu1 %v29_v47  ;;  %v1003_v62 = vld [vmem:[%s1307_s1 + $0x198] sm:$0xff]  ;;  %v994_v1 = vld [vmem:[%s1307_s1 + $0x150] sm:$0xff]  ;;  %v985_v4 = vld [vmem:[%s1307_s1 + $0x108] sm:$0xff] }
  0x23   :  { %618 = vmatpush.bf16.msrb.mxu1 %v999_v33  ;;  %584 = vmatmul.bf16.vlgmr.msra.gmra.mxu2 %v30_v44  ;;  %v1011_v63 = vld [vmem:[%s1307_s1 + $0x1d8] sm:$0xff]  ;;  %v1002_v2 = vld [vmem:[%s1307_s1 + $0x190] sm:$0xff]  ;;  %v993_v5 = vld [vmem:[%s1307_s1 + $0x148] sm:$0xff] }
  0x24   :  { %632 = vmatpush.bf16.msrb.mxu2 %v1007_v42  ;;  %598 = vmatmul.bf16.vlgmr.msra.gmra.mxu3 %v31_v45  ;;  %v1010_v3 = vld [vmem:[%s1307_s1 + $0x1d0] sm:$0xff]  ;;  %v1001_v6 = vld [vmem:[%s1307_s1 + $0x188] sm:$0xff]  ;;  %v984_v8 = vld [vmem:[%s1307_s1 + $0x100] sm:$0xff] }
  0x25   :  { %646 = vmatpush.bf16.msrb.mxu3 %v1015_v43  ;;  %v1009_v7 = vld [vmem:[%s1307_s1 + $0x1c8] sm:$0xff]  ;;  %v992_v9 = vld [vmem:[%s1307_s1 + $0x140] sm:$0xff]  ;;  %v18_v16 = vld [vmem:[%s1306_s0 + $0x30] sm:$0xff] }
  0x26   :  { %605 = vmatpush.bf16.msrb.mxu0 %v990_v48  ;;  %v1000_v10 = vld [vmem:[%s1307_s1 + $0x180] sm:$0xff]  ;;  %v17_v14 = vld [vmem:[%s1306_s0 + $0x28] sm:$0xff]  ;;  %v26_v17 = vld [vmem:[%s1306_s0 + $0x70] sm:$0xff] }
  0x27   :  { %619 = vmatpush.bf16.msrb.mxu1 %v998_v49  ;;  %v1008_v11 = vld [vmem:[%s1307_s1 + $0x1c0] sm:$0xff]  ;;  %v25_v15 = vld [vmem:[%s1306_s0 + $0x68] sm:$0xff]  ;;  %v19_v18 = vld [vmem:[%s1306_s0 + $0x38] sm:$0xff]  ;;  %v34_v22 = vpack.c.bf16 %v26_v17, %v18_v16 }
  0x28   :  { %633 = vmatpush.bf16.msrb.mxu2 %v1006_v50  ;;  %v16_v12 = vld [vmem:[%s1306_s0 + $0x20] sm:$0xff]  ;;  %v27_v19 = vld [vmem:[%s1306_s0 + $0x78] sm:$0xff]  ;;  %v33_v21 = vpack.c.bf16 %v25_v15, %v17_v14 }
  0x29   :  { %647 = vmatpush.bf16.msrb.mxu3 %v1014_v51  ;;  %v24_v13 = vld [vmem:[%s1306_s0 + $0x60] sm:$0xff]  ;;  %v35_v23 = vpack.c.bf16 %v27_v19, %v19_v18  ;;  %s1045_s0 = smov [#allocation2]  }
  0x2a   :  { %606 = vmatpush.bf16.msrb.mxu0 %v989_v52  ;;  %v32_v20 = vpack.c.bf16 %v24_v13, %v16_v12  ;;  %s682_s28 = sshll.u32 %s1045_s0, 4  ;;  %s683_s28 = int_to_ptr.vmem [resolvable:$true] %s682_s28 }
  0x2b   :  { %620 = vmatpush.bf16.msrb.mxu1 %v997_v53 }
  0x2c   :  { %634 = vmatpush.bf16.msrb.mxu2 %v1005_v54 }
  0x2d   :  { %648 = vmatpush.bf16.msrb.mxu3 %v1013_v55 }
  0x2e   :  { %607 = vmatpush.bf16.msrb.mxu0 %v988_v56 }
  0x2f   :  { %621 = vmatpush.bf16.msrb.mxu1 %v996_v57 }
  0x30   :  { %635 = vmatpush.bf16.msrb.mxu2 %v1004_v58 }
  0x31   :  { %649 = vmatpush.bf16.msrb.mxu3 %v1012_v59 }
  0x32   :  { %608 = vmatpush.bf16.msrb.mxu0 %v987_v60 }
  0x33   :  { %622 = vmatpush.bf16.msrb.mxu1 %v995_v61 }
  0x34   :  { %636 = vmatpush.bf16.msrb.mxu2 %v1003_v62 }
  0x35   :  { %650 = vmatpush.bf16.msrb.mxu3 %v1011_v63 }
  0x36   :  { %609 = vmatpush.bf16.msrb.mxu0 %v986_v0 }
  0x37   :  { %623 = vmatpush.bf16.msrb.mxu1 %v994_v1 }
  0x38   :  { %637 = vmatpush.bf16.msrb.mxu2 %v1002_v2 }
  0x39   :  { %651 = vmatpush.bf16.msrb.mxu3 %v1010_v3 }
  0x3a   :  { %610 = vmatpush.bf16.msrb.mxu0 %v985_v4 }
  0x3b   :  { %624 = vmatpush.bf16.msrb.mxu1 %v993_v5 }
  0x3c   :  { %638 = vmatpush.bf16.msrb.mxu2 %v1001_v6 }
  0x3d   :  { %652 = vmatpush.bf16.msrb.mxu3 %v1009_v7 }
  0x3e   :  { %611 = vmatpush.bf16.msrb.mxu0 %v984_v8 }
  0x3f   :  { %625 = vmatpush.bf16.msrb.mxu1 %v992_v9 }
  0x40   :  { %639 = vmatpush.bf16.msrb.mxu2 %v1000_v10 }
  0x41   :  { %653 = vmatpush.bf16.msrb.mxu3 %v1008_v11  ;;  %612 = vmatmul.bf16.vlgmr.msrb.gmra.mxu0 %v32_v20 }
  0x42   :  { %626 = vmatmul.bf16.vlgmr.msrb.gmra.mxu1 %v33_v21 }
  0x43   :  { %640 = vmatmul.bf16.vlgmr.msrb.gmra.mxu2 %v34_v22 }
  0x44   :  { %654 = vmatmul.bf16.vlgmr.msrb.gmra.mxu3 %v35_v23 }
  0x9e   :  { %v557_v24 = vpop.f32.mrf.mxu0 }
  0x9f   :  { %v571_v25 = vpop.f32.mrf.mxu1 }
  0xa0   :  { %v572_v28 = vadd.f32 %v571_v25, %v557_v24 }
  0xa6   :  { %v585_v26 = vpop.f32.mrf.mxu2  ;;  %v559_v29 = vpop.f32.mrf.mxu0 }
  0xa7   :  { %v599_v27 = vpop.f32.mrf.mxu3  ;;  %v573_v30 = vpop.f32.mrf.mxu1  ;;  %v586_v31 = vadd.f32 %v585_v26, %v572_v28 }
  0xa8   :  { %v574_v35 = vadd.f32 %v573_v30, %v559_v29 }
  0xa9   :  { %v600_v34 = vadd.f32 %v599_v27, %v586_v31 }
  0xae   :  { %v587_v32 = vpop.f32.mrf.mxu2 }
  0xaf   :  { %v601_v33 = vpop.f32.mrf.mxu3  ;;  %v588_v39 = vadd.f32 %v587_v32, %v574_v35 }
  0xb1   :  { %v602_v43 = vadd.f32 %v601_v33, %v588_v39 }
  0xbe   :  { %v613_v36 = vpop.f32.mrf.mxu0 }
  0xbf   :  { %v614_v37 = vadd.f32 %v613_v36, %v600_v34  ;;  %v627_v38 = vpop.f32.mrf.mxu1 }
  0xc1   :  { %v628_v40 = vadd.f32 %v627_v38, %v614_v37 }
  0xc6   :  { %v641_v41 = vpop.f32.mrf.mxu2  ;;  %v615_v45 = vpop.f32.mrf.mxu0 }
  0xc7   :  { %v655_v42 = vpop.f32.mrf.mxu3  ;;  %v642_v44 = vadd.f32 %v641_v41, %v628_v40  ;;  %v616_v47 = vadd.f32 %v615_v45, %v602_v43  ;;  %v629_v48 = vpop.f32.mrf.mxu1 }
  0xc9   :  { %v656_v46 = vadd.f32 %v655_v42, %v642_v44  ;;  %v630_v49 = vadd.f32 %v629_v48, %v616_v47 }
  0xcb   :  { %665 = vst.msk [vmem:[#allocation2] sm:$0xff] %vm664_vm0, %v656_v46 }
  0xce   :  { %v643_v50 = vpop.f32.mrf.mxu2 }
  0xcf   :  { %v644_v51 = vadd.f32 %v643_v50, %v630_v49  ;;  %v657_v52 = vpop.f32.mrf.mxu3 }
  0xd1   :  { %v658_v53 = vadd.f32 %v657_v52, %v644_v51 }
  0xd3   :  { %666 = vst.msk [vmem:[#allocation2 + $0x8] sm:$0xff] %vm664_vm0, %v658_v53 }
  0xd4   :  { %690 = dma.vmem_to_hbm [thread:$0]  %s683_s28, 256, %s685_s3, [#allocation3], %s1046_s4, %s1046_s4, %s1047_s5  }
  0xd5   :  { %1043 = dma.done.wait [#allocation3], 256  }
  0xd6   :  { %1044 = vsyncadd [#allocation3], 4294967040 }
  0xd7   :  { %695 = vsyncpa [#allocation3], 1 }

</bundles_post_ra>
